<compile_context>
chip_gen: v7x
topology: tpu7x:2x2x1
jax: 0.10.0
libtpu: 0.0.40
codegen_flags: <defaults>
</compile_context>

<pallas_src>
import functools
import math

import jax
import jax.numpy as jnp
from jax.experimental import pallas as pl
from jax.experimental.pallas import tpu as pltpu


def _round_up(n, m):
    return ((n + m - 1) // m) * m


# ---------------------------------------------------------------------------
# Hardware-derived knobs (trace-time Python queries; safe fallbacks).
# ---------------------------------------------------------------------------
def _vmem_limit_bytes():
    """~75% of physical per-core VMEM: 48 MiB on v7x, 96 MiB on v5e/v6e."""
    try:
        return int(pltpu.get_tpu_info().vmem_capacity_bytes) * 3 // 4
    except Exception:
        return 48 * 1024 * 1024          # safe on every generation


def _activation_dtype():
    """bf16 activations on v6e/v7x (bf16 VPU/EUP); keep f32 on older chips."""
    try:
        kind = jax.devices()[0].device_kind.lower()
    except Exception:
        return jnp.float32
    for old in ("v2", "v3", "v4", "v5"):
        if old in kind:
            return jnp.float32
    return jnp.bfloat16


def _weight_spec_kwargs():
    """Single-buffer the constant weight/bias blocks if pipeline_mode exists."""
    try:
        pl.BlockSpec((8, 128), lambda i: (0, 0), pipeline_mode=pl.Buffered(1))
        return dict(pipeline_mode=pl.Buffered(1)), 1
    except Exception:
        return {}, 2                      # fall back to default double-buffering


def _pick_tile_rows(b_pad8, fp, hp, lp, x_itemsize, out_itemsize,
                    weight_vmem_bytes, vmem_budget):
    """Largest multiple-of-8 row tile that fits the VMEM budget."""
    per_row = (2 * fp * x_itemsize                 # double-buffered x tile
               + 2 * (fp + lp) * out_itemsize      # double-buffered output tiles
               + 4 * max(fp, hp, lp) * 4)          # live intermediates (h,z,h2,logits)
    avail = vmem_budget - weight_vmem_bytes - (4 << 20)   # Mosaic scratch headroom
    tb = (max(avail, 8 * per_row) // per_row) // 8 * 8
    tb = int(max(8, min(tb, 1024, b_pad8)))
    # Keep >= 2 grid steps so the "parallel" batch axis can use both v7x cores.
    if b_pad8 >= 16:
        tb = min(tb, int(_round_up(int(pl.cdiv(b_pad8, 2)), 8)))
    return tb


# ---------------------------------------------------------------------------
# Kernel: one batch tile [TB, *] per grid step; weights/biases are constant
# blocks (index_map always (0, 0)) reused across all grid steps.
# ---------------------------------------------------------------------------
def endecoder_kernel(x_ref,
                     we0_ref, be0_ref, we1_ref, be1_ref,
                     wd0_ref, bd0_ref, wd1_ref, bd1_ref,
                     xpred_ref, znorm_ref, *, act_dtype):
    x = x_ref[...].astype(jnp.bfloat16)              # [TB, FP] bf16 MXU input

    # ---- encoder: Linear(feat->hidden) + tanh, Linear(hidden->latent) ----
    h = jnp.tanh(
        (jnp.dot(x, we0_ref[...], preferred_element_type=jnp.float32)
         + be0_ref[...]).astype(act_dtype))
    z = (jnp.dot(h.astype(jnp.bfloat16), we1_ref[...],
                 preferred_element_type=jnp.float32)
         + be1_ref[...])                             # f32 [TB, LP]

    # ---- F.normalize(z, p=2, dim=1): z / max(||z||, 1e-12), via rsqrt (EUP) --
    sumsq = jnp.sum(z * z, axis=1, keepdims=True)
    inv = jax.lax.rsqrt(jnp.maximum(sumsq, 1e-24))
    z_norm = z * inv                                 # f32 [TB, LP]

    # ---- decoder: Linear(latent->hidden) + tanh, Linear(hidden->feat) ----
    h2 = jnp.tanh(
        (jnp.dot(z_norm.astype(jnp.bfloat16), wd0_ref[...],
                 preferred_element_type=jnp.float32)
         + bd0_ref[...]).astype(act_dtype))
    logits = (jnp.dot(h2.astype(jnp.bfloat16), wd1_ref[...],
                      preferred_element_type=jnp.float32)
              + bd1_ref[...])                        # f32 [TB, FP]

    xpred_ref[...] = jax.nn.sigmoid(logits).astype(xpred_ref.dtype)
    znorm_ref[...] = z_norm.astype(znorm_ref.dtype)


# ---------------------------------------------------------------------------
# One-time param preparation: pad lane dims to 128, cast weights to bf16.
# ---------------------------------------------------------------------------
def pad_params(params):
    F, H = params["we0"].shape
    L = params["we1"].shape[1]
    FP, HP, LP = (_round_up(d, 128) for d in (F, H, L))

    def pw(w, rows, cols):
        return (jnp.zeros((rows, cols), jnp.bfloat16)
                .at[:w.shape[0], :w.shape[1]].set(w.astype(jnp.bfloat16)))

    def pb(b, cols):
        return (jnp.zeros((1, cols), jnp.float32)
                .at[:, :b.shape[1]].set(b.astype(jnp.float32)))

    padded = dict(
        we0=pw(params["we0"], FP, HP), be0=pb(params["be0"], HP),
        we1=pw(params["we1"], HP, LP), be1=pb(params["be1"], LP),
        wd0=pw(params["wd0"], LP, HP), bd0=pb(params["bd0"], HP),
        wd1=pw(params["wd1"], HP, FP), bd1=pb(params["bd1"], FP),
    )
    return padded, (F, H, L)


# ---------------------------------------------------------------------------
# Forward wrapper.
# ---------------------------------------------------------------------------
@functools.partial(jax.jit, static_argnames=("dims", "out_dtype"))
def endecoder_forward(x, padded, dims, out_dtype=jnp.bfloat16):
    F, H, L = dims
    B = x.shape[0]
    FP, HP, LP = _round_up(F, 128), _round_up(H, 128), _round_up(L, 128)
    B_pad8 = _round_up(B, 8)

    # ---- input prep: pad only when needed; otherwise pass f32 straight in ----
    if FP != F:
        xp = (jnp.zeros((B_pad8, FP), jnp.bfloat16)
              .at[:B, :F].set(x.astype(jnp.bfloat16)))      # pad+cast in one pass
    elif B_pad8 != B:
        xp = jnp.zeros((B_pad8, FP), x.dtype).at[:B].set(x)  # tiny row pad only
    else:
        xp = x                                    # untouched; cast inside kernel
    x_itemsize = jnp.dtype(xp.dtype).itemsize
    out_itemsize = jnp.dtype(out_dtype).itemsize

    wspec_kwargs, weight_buf = _weight_spec_kwargs()
    weight_hbm_bytes = sum(int(v.size) * jnp.dtype(v.dtype).itemsize
                           for v in padded.values())
    vmem_budget = _vmem_limit_bytes()
    TB = _pick_tile_rows(B_pad8, FP, HP, LP, x_itemsize, out_itemsize,
                         weight_buf * weight_hbm_bytes, vmem_budget)
    grid = (int(pl.cdiv(B_pad8, TB)),)            # partial last tile is masked

    def row_spec(last):
        return pl.BlockSpec((TB, last), lambda i: (i, 0))

    def const_spec(shape):
        return pl.BlockSpec(shape, lambda i: (0, 0), **wspec_kwargs)

    cost = pl.CostEstimate(
        flops=2 * B_pad8 * (FP * HP + HP * LP + LP * HP + HP * FP),
        transcendentals=B_pad8 * (2 * HP + FP + 1),
        bytes_accessed=(int(xp.size) * x_itemsize + weight_hbm_bytes
                        + B_pad8 * (FP + LP) * out_itemsize),
    )

    kernel = functools.partial(endecoder_kernel, act_dtype=_activation_dtype())

    x_pred_p, z_norm_p = pl.pallas_call(
        kernel,
        out_shape=(jax.ShapeDtypeStruct((B_pad8, FP), out_dtype),
                   jax.ShapeDtypeStruct((B_pad8, LP), out_dtype)),
        grid=grid,
        in_specs=[
            row_spec(FP),                                    # x tile
            const_spec((FP, HP)), const_spec((1, HP)),       # enc layer 0
            const_spec((HP, LP)), const_spec((1, LP)),       # enc layer 1
            const_spec((LP, HP)), const_spec((1, HP)),       # dec layer 0
            const_spec((HP, FP)), const_spec((1, FP)),       # dec layer 1
        ],
        out_specs=(row_spec(FP), row_spec(LP)),
        compiler_params=pltpu.CompilerParams(
            dimension_semantics=("parallel",),               # megacore on v7x
            vmem_limit_bytes=vmem_budget,
        ),
        cost_estimate=cost,
    )(xp, padded["we0"], padded["be0"], padded["we1"], padded["be1"],
      padded["wd0"], padded["bd0"], padded["wd1"], padded["bd1"])

    # slice padding off only when it exists (padded x_pred cols hold sigmoid(0)=0.5)
    x_pred = x_pred_p if (B_pad8 == B and FP == F) else x_pred_p[:B, :F]
    z_norm = z_norm_p if (B_pad8 == B and LP == L) else z_norm_p[:B, :L]
    return x_pred, z_norm


# ---------------------------------------------------------------------------
# Param init mimicking PyTorch nn.Linear defaults; weights stored [in, out].
# ---------------------------------------------------------------------------
def init_linear(key, in_dim, out_dim):
    kw, kb = jax.random.split(key)
    bound = 1.0 / math.sqrt(in_dim)        # kaiming_uniform(a=sqrt(5)) bound
    w = jax.random.uniform(kw, (out_dim, in_dim), jnp.float32,
                           minval=-bound, maxval=bound)
    b = jax.random.uniform(kb, (out_dim,), jnp.float32,
                           minval=-bound, maxval=bound)
    return w.T, b.reshape(1, out_dim)


def make_params(key, feat_dim, hidden_dim, latent_dim):
    k0, k1, k2, k3 = jax.random.split(key, 4)
    we0, be0 = init_linear(k0, feat_dim, hidden_dim)     # enc layer 0
    we1, be1 = init_linear(k1, hidden_dim, latent_dim)   # enc layer 1
    wd0, bd0 = init_linear(k2, latent_dim, hidden_dim)   # dec layer 0
    wd1, bd1 = init_linear(k3, hidden_dim, feat_dim)     # dec layer 1
    return dict(we0=we0, be0=be0, we1=we1, be1=be1,
                wd0=wd0, bd0=bd0, wd1=wd1, bd1=bd1)


def reference_forward(x, p):
    """Plain-JAX f32 reference for correctness checking."""
    h = jnp.tanh(x @ p["we0"] + p["be0"])
    z = h @ p["we1"] + p["be1"]
    z_norm = z / jnp.maximum(
        jnp.sqrt(jnp.sum(z * z, axis=1, keepdims=True)), 1e-12)
    h2 = jnp.tanh(z_norm @ p["wd0"] + p["bd0"])
    x_pred = jax.nn.sigmoid(h2 @ p["wd1"] + p["bd1"])
    return x_pred, z_norm


if __name__ == "__main__":
    def run_case(key, batch, feat, hidden, latent):
        kx, kp = jax.random.split(key)
        x = jax.random.normal(kx, (batch, feat), jnp.float32)
        params = make_params(kp, feat, hidden, latent)
        padded, dims = pad_params(params)            # one-time pad/cast

        x_pred, z_norm = endecoder_forward(x, padded, dims)
        jax.block_until_ready((x_pred, z_norm))

        assert x_pred.shape == (batch, feat), x_pred.shape
        assert z_norm.shape == (batch, latent), z_norm.shape

        # bf16 MXU inputs, bf16 activations (v6e/v7x) and bf16 outputs vs an
        # f32 reference -> loose-but-meaningful tolerance.
        x_ref, z_ref = reference_forward(x, params)
        xe = float(jnp.max(jnp.abs(x_pred.astype(jnp.float32) - x_ref)))
        ze = float(jnp.max(jnp.abs(z_norm.astype(jnp.float32) - z_ref)))
        assert xe < 7.5e-2, f"x_pred max abs err {xe}"
        assert ze < 7.5e-2, f"z_norm max abs err {ze}"

    key = jax.random.PRNGKey(0)
    k1, k2 = jax.random.split(key)

    # Small case: lane-padded dims, single-tile grid.
    run_case(k1, batch=8, feat=32, hidden=32, latent=16)
    # Aligned-feature case: x passes through unpadded (f32, in-kernel cast),
    # batch 100 -> pad to 104, 2-step grid with a partial last tile.
    run_case(k2, batch=100, feat=128, hidden=64, latent=32)

    print("KERNEL_OK")
</pallas_src>

<mosaic_0001>
module attributes {stable_mosaic.version = 11 : i64} {
  func.func @endecoder_kernel(%arg0: i32, %arg1: memref<8x128xbf16, #tpu.memory_space<vmem>>, %arg2: memref<128x128xbf16, #tpu.memory_space<vmem>>, %arg3: memref<1x128xf32, #tpu.memory_space<vmem>>, %arg4: memref<128x128xbf16, #tpu.memory_space<vmem>>, %arg5: memref<1x128xf32, #tpu.memory_space<vmem>>, %arg6: memref<128x128xbf16, #tpu.memory_space<vmem>>, %arg7: memref<1x128xf32, #tpu.memory_space<vmem>>, %arg8: memref<128x128xbf16, #tpu.memory_space<vmem>>, %arg9: memref<1x128xf32, #tpu.memory_space<vmem>>, %arg10: memref<8x128xbf16, #tpu.memory_space<vmem>>, %arg11: memref<8x128xbf16, #tpu.memory_space<vmem>>) attributes {dimension_semantics = [#tpu.dimension_semantics<parallel>], iteration_bounds = array<i64: 1>, scalar_prefetch = 0 : i64, scratch_operands = 0 : i64, tpu.core_type = #tpu.core_type<tc>, window_params = [{transform_indices = @transform_0, window_bounds = array<i64: 8, 128>}, {pipeline_mode = #tpu.pipeline_mode<synchronous>, transform_indices = @transform_1, window_bounds = array<i64: 128, 128>}, {pipeline_mode = #tpu.pipeline_mode<synchronous>, transform_indices = @transform_2, window_bounds = array<i64: 1, 128>}, {pipeline_mode = #tpu.pipeline_mode<synchronous>, transform_indices = @transform_3, window_bounds = array<i64: 128, 128>}, {pipeline_mode = #tpu.pipeline_mode<synchronous>, transform_indices = @transform_4, window_bounds = array<i64: 1, 128>}, {pipeline_mode = #tpu.pipeline_mode<synchronous>, transform_indices = @transform_5, window_bounds = array<i64: 128, 128>}, {pipeline_mode = #tpu.pipeline_mode<synchronous>, transform_indices = @transform_6, window_bounds = array<i64: 1, 128>}, {pipeline_mode = #tpu.pipeline_mode<synchronous>, transform_indices = @transform_7, window_bounds = array<i64: 128, 128>}, {pipeline_mode = #tpu.pipeline_mode<synchronous>, transform_indices = @transform_8, window_bounds = array<i64: 1, 128>}, {transform_indices = @transform_9, window_bounds = array<i64: 8, 128>}, {transform_indices = @transform_10, window_bounds = array<i64: 8, 128>}]} {
    %c0 = arith.constant 0 : index
    %c0_0 = arith.constant 0 : index
    %0 = vector.load %arg1[%c0, %c0_0] : memref<8x128xbf16, #tpu.memory_space<vmem>>, vector<8x128xbf16>
    %c0_1 = arith.constant 0 : index
    %c0_2 = arith.constant 0 : index
    %1 = vector.load %arg2[%c0_1, %c0_2] : memref<128x128xbf16, #tpu.memory_space<vmem>>, vector<128x128xbf16>
    %cst = arith.constant dense<0.000000e+00> : vector<8x128xf32>
    %2 = tpu.matmul %0, %1, %cst {dimension_numbers = #tpu.dot_dimension_numbers<[1], [0], [0], [1], [0, 0, 1, 1], [], []>} : vector<8x128xbf16>, vector<128x128xbf16>, vector<8x128xf32> -> vector<8x128xf32>
    %c0_3 = arith.constant 0 : index
    %c0_4 = arith.constant 0 : index
    %3 = vector.load %arg3[%c0_3, %c0_4] : memref<1x128xf32, #tpu.memory_space<vmem>>, vector<1x128xf32>
    %4 = vector.broadcast %3 : vector<1x128xf32> to vector<8x128xf32>
    %5 = arith.addf %2, %4 : vector<8x128xf32>
    %6 = arith.truncf %5 : vector<8x128xf32> to vector<8x128xbf16>
    %7 = math.tanh %6 : vector<8x128xbf16>
    %c0_5 = arith.constant 0 : index
    %c0_6 = arith.constant 0 : index
    %8 = vector.load %arg4[%c0_5, %c0_6] : memref<128x128xbf16, #tpu.memory_space<vmem>>, vector<128x128xbf16>
    %cst_7 = arith.constant dense<0.000000e+00> : vector<8x128xf32>
    %9 = tpu.matmul %7, %8, %cst_7 {dimension_numbers = #tpu.dot_dimension_numbers<[1], [0], [0], [1], [0, 0, 1, 1], [], []>} : vector<8x128xbf16>, vector<128x128xbf16>, vector<8x128xf32> -> vector<8x128xf32>
    %c0_8 = arith.constant 0 : index
    %c0_9 = arith.constant 0 : index
    %10 = vector.load %arg5[%c0_8, %c0_9] : memref<1x128xf32, #tpu.memory_space<vmem>>, vector<1x128xf32>
    %11 = vector.broadcast %10 : vector<1x128xf32> to vector<8x128xf32>
    %12 = arith.addf %9, %11 : vector<8x128xf32>
    %13 = arith.mulf %12, %12 : vector<8x128xf32>
    %cst_10 = arith.constant dense<0.000000e+00> : vector<8xf32>
    %14 = vector.multi_reduction <add>, %13, %cst_10 [1] : vector<8x128xf32> to vector<8xf32>
    %15 = vector.shape_cast %14 : vector<8xf32> to vector<8x1xf32>
    %cst_11 = arith.constant 1.000000e-24 : f32
    %16 = vector.broadcast %cst_11 : f32 to vector<8x1xf32>
    %17 = arith.maximumf %15, %16 : vector<8x1xf32>
    %18 = math.rsqrt %17 : vector<8x1xf32>
    %19 = vector.broadcast %18 : vector<8x1xf32> to vector<8x128xf32>
    %20 = arith.mulf %12, %19 : vector<8x128xf32>
    %21 = arith.truncf %20 : vector<8x128xf32> to vector<8x128xbf16>
    %c0_12 = arith.constant 0 : index
    %c0_13 = arith.constant 0 : index
    %22 = vector.load %arg6[%c0_12, %c0_13] : memref<128x128xbf16, #tpu.memory_space<vmem>>, vector<128x128xbf16>
    %cst_14 = arith.constant dense<0.000000e+00> : vector<8x128xf32>
    %23 = tpu.matmul %21, %22, %cst_14 {dimension_numbers = #tpu.dot_dimension_numbers<[1], [0], [0], [1], [0, 0, 1, 1], [], []>} : vector<8x128xbf16>, vector<128x128xbf16>, vector<8x128xf32> -> vector<8x128xf32>
    %c0_15 = arith.constant 0 : index
    %c0_16 = arith.constant 0 : index
    %24 = vector.load %arg7[%c0_15, %c0_16] : memref<1x128xf32, #tpu.memory_space<vmem>>, vector<1x128xf32>
    %25 = vector.broadcast %24 : vector<1x128xf32> to vector<8x128xf32>
    %26 = arith.addf %23, %25 : vector<8x128xf32>
    %27 = arith.truncf %26 : vector<8x128xf32> to vector<8x128xbf16>
    %28 = math.tanh %27 : vector<8x128xbf16>
    %c0_17 = arith.constant 0 : index
    %c0_18 = arith.constant 0 : index
    %29 = vector.load %arg8[%c0_17, %c0_18] : memref<128x128xbf16, #tpu.memory_space<vmem>>, vector<128x128xbf16>
    %cst_19 = arith.constant dense<0.000000e+00> : vector<8x128xf32>
    %30 = tpu.matmul %28, %29, %cst_19 {dimension_numbers = #tpu.dot_dimension_numbers<[1], [0], [0], [1], [0, 0, 1, 1], [], []>} : vector<8x128xbf16>, vector<128x128xbf16>, vector<8x128xf32> -> vector<8x128xf32>
    %c0_20 = arith.constant 0 : index
    %c0_21 = arith.constant 0 : index
    %31 = vector.load %arg9[%c0_20, %c0_21] : memref<1x128xf32, #tpu.memory_space<vmem>>, vector<1x128xf32>
    %32 = vector.broadcast %31 : vector<1x128xf32> to vector<8x128xf32>
    %33 = arith.addf %30, %32 : vector<8x128xf32>
    %34 = arith.negf %33 : vector<8x128xf32>
    %35 = math.exp %34 : vector<8x128xf32>
    %cst_22 = arith.constant 1.000000e+00 : f32
    %36 = vector.broadcast %cst_22 : f32 to vector<8x128xf32>
    %37 = arith.addf %36, %35 : vector<8x128xf32>
    %38 = arith.divf %36, %37 : vector<8x128xf32>
    %39 = arith.truncf %38 : vector<8x128xf32> to vector<8x128xbf16>
    %c0_23 = arith.constant 0 : index
    %c0_24 = arith.constant 0 : index
    %40 = vector.load %arg10[%c0_23, %c0_24] : memref<8x128xbf16, #tpu.memory_space<vmem>>, vector<8x128xbf16>
    tpu.vector_store %arg10[%c0_23, %c0_24], %39 {strides = array<i32>} : memref<8x128xbf16, #tpu.memory_space<vmem>>, vector<8x128xbf16>,
    %41 = arith.truncf %20 : vector<8x128xf32> to vector<8x128xbf16>
    %c0_25 = arith.constant 0 : index
    %c0_26 = arith.constant 0 : index
    %42 = vector.load %arg11[%c0_25, %c0_26] : memref<8x128xbf16, #tpu.memory_space<vmem>>, vector<8x128xbf16>
    tpu.vector_store %arg11[%c0_25, %c0_26], %41 {strides = array<i32>} : memref<8x128xbf16, #tpu.memory_space<vmem>>, vector<8x128xbf16>,
    return
  }
  func.func @transform_0(%arg0: i32) -> (i32, i32) {
    %c0_i32 = arith.constant 0 : i32
    %c0_i32_0 = arith.constant 0 : i32
    return %arg0, %c0_i32 : i32, i32
  }
  func.func @transform_1(%arg0: i32) -> (i32, i32) {
    %c0_i32 = arith.constant 0 : i32
    %c0_i32_0 = arith.constant 0 : i32
    %c0_i32_1 = arith.constant 0 : i32
    return %c0_i32, %c0_i32_0 : i32, i32
  }
  func.func @transform_2(%arg0: i32) -> (i32, i32) {
    %c0_i32 = arith.constant 0 : i32
    %c0_i32_0 = arith.constant 0 : i32
    %c0_i32_1 = arith.constant 0 : i32
    return %c0_i32, %c0_i32_0 : i32, i32
  }
  func.func @transform_3(%arg0: i32) -> (i32, i32) {
    %c0_i32 = arith.constant 0 : i32
    %c0_i32_0 = arith.constant 0 : i32
    %c0_i32_1 = arith.constant 0 : i32
    return %c0_i32, %c0_i32_0 : i32, i32
  }
  func.func @transform_4(%arg0: i32) -> (i32, i32) {
    %c0_i32 = arith.constant 0 : i32
    %c0_i32_0 = arith.constant 0 : i32
    %c0_i32_1 = arith.constant 0 : i32
    return %c0_i32, %c0_i32_0 : i32, i32
  }
  func.func @transform_5(%arg0: i32) -> (i32, i32) {
    %c0_i32 = arith.constant 0 : i32
    %c0_i32_0 = arith.constant 0 : i32
    %c0_i32_1 = arith.constant 0 : i32
    return %c0_i32, %c0_i32_0 : i32, i32
  }
  func.func @transform_6(%arg0: i32) -> (i32, i32) {
    %c0_i32 = arith.constant 0 : i32
    %c0_i32_0 = arith.constant 0 : i32
    %c0_i32_1 = arith.constant 0 : i32
    return %c0_i32, %c0_i32_0 : i32, i32
  }
  func.func @transform_7(%arg0: i32) -> (i32, i32) {
    %c0_i32 = arith.constant 0 : i32
    %c0_i32_0 = arith.constant 0 : i32
    %c0_i32_1 = arith.constant 0 : i32
    return %c0_i32, %c0_i32_0 : i32, i32
  }
  func.func @transform_8(%arg0: i32) -> (i32, i32) {
    %c0_i32 = arith.constant 0 : i32
    %c0_i32_0 = arith.constant 0 : i32
    %c0_i32_1 = arith.constant 0 : i32
    return %c0_i32, %c0_i32_0 : i32, i32
  }
  func.func @transform_9(%arg0: i32) -> (i32, i32) {
    %c0_i32 = arith.constant 0 : i32
    %c0_i32_0 = arith.constant 0 : i32
    return %arg0, %c0_i32 : i32, i32
  }
  func.func @transform_10(%arg0: i32) -> (i32, i32) {
    %c0_i32 = arith.constant 0 : i32
    %c0_i32_0 = arith.constant 0 : i32
    return %arg0, %c0_i32 : i32, i32
  }
}

</mosaic_0001>

<bundles_post_ra>
// kernel: endecoder_forward.1
= control target key start
LH: loop header
LB: loop body
LE: loop exit
PB: predicated region body
PF: predicated region fallthrough
CT: control target
= control target key end

     0   :  { %16 = vsyncpa [#allocation3], 0  ;;  %s1153_s0 = inlined_call_operand.vmem [shape: bf16[8,128], index: 0, kind: input, shape index: {}]   ;;  %s1154_s1 = inlined_call_operand.hbm [shape: bf16[128,128], index: 1, kind: input, shape index: {}]   ;;  %s1155_s2 = inlined_call_operand.vmem [shape: f32[1,128], index: 2, kind: input, shape index: {}]   ;;  %s1156_s3 = inlined_call_operand.hbm [shape: bf16[128,128], index: 3, kind: input, shape index: {}]   ;;  %s1157_s4 = inlined_call_operand.vmem [shape: f32[1,128], index: 4, kind: input, shape index: {}]   ;;  %s1158_s5 = inlined_call_operand.hbm [shape: bf16[128,128], index: 5, kind: input, shape index: {}]   ;;  %s1159_s6 = inlined_call_operand.vmem [shape: f32[1,128], index: 6, kind: input, shape index: {}]   ;;  %s1160_s7 = inlined_call_operand.hbm [shape: bf16[128,128], index: 7, kind: input, shape index: {}]   ;;  %s1161_s8 = inlined_call_operand.vmem [shape: f32[1,128], index: 8, kind: input, shape index: {}]   ;;  %s1162_s9 = inlined_call_operand.hbm [shape: bf16[8,128], index: 9, kind: output, shape index: {0}]   ;;  %s1163_s10 = inlined_call_operand.hbm [shape: bf16[8,128], index: 10, kind: output, shape index: {1}]  }
   0x1   :  { %17 = vsyncpa [#allocation6], 0 }
   0x2   :  { %18 = vsyncpa [#allocation9], 0 }
   0x3   :  { %19 = vsyncpa [#allocation4], 0 }
   0x4   :  { %20 = vsyncpa [#allocation12], 0  ;;  %s935_s13 = smov [#allocation5]   ;;  %s936_s15 = smov [#allocation2]  }
   0x5   :  { %s42_s14 = sshll.u32 %s935_s13, 4  ;;  %s28_s16 = sshll.u32 %s936_s15, 4  ;;  %s43_s14 = int_to_ptr.vmem [resolvable:$true] %s42_s14  ;;  %s1000_s16 = int_to_ptr.vmem [resolvable:$true] %s28_s16 }
   0x6   :  { %s793_s19 = scalar_lea.hbm %s1156_s3, 1024 }
   0x7   :  { %p794_p0 = scmp.ne.s32.totalorder %s1156_s3, %s793_s19  ;;  %p797_p1 = scmp.lt.u32.totalorder %s793_s19, %s1156_s3 }
   0x9   :  { %p799_p2 = pnand %p797_p1, %p794_p0 }
   0xb   :  { %802 = shalt.err (!%p799_p2)
}
   0xc   :  { %s803_s24 = scalar_lea.vmem %s43_s14, 1024  ;;  %p808_p4 = scmp.lt.s32.totalorder %s43_s14, %s43_s14 }
   0xd   :  { %p804_p3 = scmp.ne.s32.totalorder %s43_s14, %s803_s24  ;;  %p809_p5 = scmp.lt.s32.totalorder %s803_s24, %s803_s24 }
   0xf   :  { %p810_p6 = por %p809_p5, %p808_p4 }
  0x11   :  { %p811_p7 = pnand %p810_p6, %p804_p3 }
  0x13   :  { %814 = shalt.err (!%p811_p7)
}
  0x14   :  { %s937_s25 = smov 64   ;;  %s938_s26 = smov 4  }
  0x15   :  { %48 = dma.hbm_to_vmem [thread:$0]  %s1156_s3, 1024, %s43_s14, [#allocation6], %s937_s25, %s937_s25, %s938_s26  }
  0x16   :  { %s815_s11 = scalar_lea.hbm %s1154_s1, 1024 }
  0x17   :  { %p816_p8 = scmp.ne.s32.totalorder %s1154_s1, %s815_s11  ;;  %p819_p9 = scmp.lt.u32.totalorder %s815_s11, %s1154_s1 }
  0x19   :  { %p821_p10 = pnand %p819_p9, %p816_p8 }
  0x1b   :  { %824 = shalt.err (!%p821_p10)
}
  0x1c   :  { %s825_s18 = scalar_lea.vmem %s1000_s16, 1024  ;;  %p830_p12 = scmp.lt.s32.totalorder %s1000_s16, %s1000_s16 }
  0x1d   :  { %p826_p11 = scmp.ne.s32.totalorder %s1000_s16, %s825_s18  ;;  %p831_p13 = scmp.lt.s32.totalorder %s825_s18, %s825_s18 }
  0x1f   :  { %p832_p0 = por %p831_p13, %p830_p12 }
  0x21   :  { %p833_p1 = pnand %p832_p0, %p826_p11 }
  0x23   :  { %836 = shalt.err (!%p833_p1)
}
  0x24   :  { %34 = dma.hbm_to_vmem [thread:$0]  %s1154_s1, 1024, %s1000_s16, [#allocation3], %s937_s25, %s937_s25, %s938_s26  }
  0x25   :  { %s939_s19 = smov [#allocation7]   ;;  %s940_s21 = smov [#allocation8]  }
  0x26   :  { %s56_s20 = sshll.u32 %s939_s19, 4  ;;  %s70_s22 = sshll.u32 %s940_s21, 4  ;;  %s57_s20 = int_to_ptr.vmem [resolvable:$true] %s56_s20  ;;  %s1037_s22 = int_to_ptr.vmem [resolvable:$true] %s70_s22 }
  0x27   :  { %s837_s27 = scalar_lea.hbm %s1158_s5, 1024 }
  0x28   :  { %p838_p2 = scmp.ne.s32.totalorder %s1158_s5, %s837_s27  ;;  %p841_p3 = scmp.lt.u32.totalorder %s837_s27, %s1158_s5 }
  0x2a   :  { %p843_p4 = pnand %p841_p3, %p838_p2 }
  0x2c   :  { %846 = shalt.err (!%p843_p4)
}
  0x2d   :  { %s847_s1 = scalar_lea.vmem %s57_s20, 1024  ;;  %p852_p6 = scmp.lt.s32.totalorder %s57_s20, %s57_s20 }
  0x2e   :  { %p848_p5 = scmp.ne.s32.totalorder %s57_s20, %s847_s1  ;;  %p853_p7 = scmp.lt.s32.totalorder %s847_s1, %s847_s1 }
  0x30   :  { %p854_p8 = por %p853_p7, %p852_p6 }
  0x32   :  { %p855_p9 = pnand %p854_p8, %p848_p5 }
  0x34   :  { %858 = shalt.err (!%p855_p9)
}
  0x35   :  { %62 = dma.hbm_to_vmem [thread:$0]  %s1158_s5, 1024, %s57_s20, [#allocation6], %s937_s25, %s937_s25, %s938_s26  }
  0x36   :  { %s859_s17 = scalar_lea.hbm %s1160_s7, 1024 }
  0x37   :  { %p860_p10 = scmp.ne.s32.totalorder %s1160_s7, %s859_s17  ;;  %p863_p11 = scmp.lt.u32.totalorder %s859_s17, %s1160_s7 }
  0x39   :  { %p865_p12 = pnand %p863_p11, %p860_p10 }
  0x3b   :  { %868 = shalt.err (!%p865_p12)
}
  0x3c   :  { %s869_s21 = scalar_lea.vmem %s1037_s22, 1024  ;;  %p874_p0 = scmp.lt.s32.totalorder %s1037_s22, %s1037_s22 }
  0x3d   :  { %p870_p13 = scmp.ne.s32.totalorder %s1037_s22, %s869_s21  ;;  %p875_p1 = scmp.lt.s32.totalorder %s869_s21, %s869_s21 }
  0x3f   :  { %p876_p2 = por %p875_p1, %p874_p0 }
  0x41   :  { %p877_p3 = pnand %p876_p2, %p870_p13 }
  0x43   :  { %880 = shalt.err (!%p877_p3)
}
  0x44   :  { %76 = dma.hbm_to_vmem [thread:$0]  %s1160_s7, 1024, %s1037_s22, [#allocation9], %s937_s25, %s937_s25, %s938_s26  }
  0x45   :  { %925 = dma.done.wait [#allocation3], 1024  }
  0x46   :  { %926 = vsyncadd [#allocation3], 4294966272 }
  0x47   :  { %927 = dma.done.wait [#allocation6], 2048  }
  0x48   :  { %928 = vsyncadd [#allocation6], 4294965248 }
  0x49   :  { %929 = dma.done.wait [#allocation9], 1024  }
  0x4a   :  { %930 = vsyncadd [#allocation9], 4294966272  ;;  %v941_v0 = vmov 0.0   ;;  %vm942_vm0 = vmmov 0   ;;  %v751_v1 = vld [vmem:[#allocation2] sm:$0xff]   ;;  %v752_v2 = vld [vmem:[#allocation2 + $0x8] sm:$0xff]  }
  0x4b   :  { %661 = vmatprep.subr.bf16.mxu0 %v941_v0  ;;  %677 = vmatprep.mubr.msk.bf16.mxu0 %vm942_vm0, %v941_v0  ;;  %v753_v3 = vld [vmem:[#allocation2 + $0x10] sm:$0xff]   ;;  %v759_v4 = vld [vmem:[#allocation5] sm:$0xff]   ;;  %v754_v5 = vld [vmem:[#allocation2 + $0x18] sm:$0xff]   ;;  %s943_s24 = smov [#allocation11]  }
  0x4c   :  { %681 = vmatprep.subr.bf16.mxu1 %v941_v0  ;;  %697 = vmatprep.mubr.msk.bf16.mxu1 %vm942_vm0, %v941_v0  ;;  %v760_v6 = vld [vmem:[#allocation5 + $0x8] sm:$0xff]   ;;  %v755_v7 = vld [vmem:[#allocation2 + $0x20] sm:$0xff]   ;;  %v761_v8 = vld [vmem:[#allocation5 + $0x10] sm:$0xff]   ;;  %s573_s27 = sshll.u32 %s943_s24, 4  ;;  %s574_s27 = int_to_ptr.vmem [resolvable:$true] %s573_s27 }
  0x4d   :  { %662 = vmatpush3.bf16.msra.mxu0 %v751_v1  ;;  %682 = vmatpush3.bf16.msra.mxu1 %v759_v4  ;;  %v756_v9 = vld [vmem:[#allocation2 + $0x28] sm:$0xff]   ;;  %v762_v10 = vld [vmem:[#allocation5 + $0x18] sm:$0xff]   ;;  %v757_v11 = vld [vmem:[#allocation2 + $0x30] sm:$0xff]   ;;  %s881_s28 = scalar_lea.vmem %s574_s27, 64  ;;  %p886_p5 = scmp.lt.s32.totalorder %s574_s27, %s574_s27 }
  0x4e   :  { %663 = vmatprep.subr.bf16.mxu0 %v941_v0  ;;  %683 = vmatprep.subr.bf16.mxu1 %v941_v0  ;;  %v758_v12 = vld [vmem:[#allocation2 + $0x38] sm:$0xff]   ;;  %v92_v13 = vld [vmem:[%s1153_s0] sm:$0xf]  ;;  %v764_v15 = vld [vmem:[#allocation5 + $0x28] sm:$0xff]   ;;  %p882_p4 = scmp.ne.s32.totalorder %s574_s27, %s881_s28  ;;  %p887_p6 = scmp.lt.s32.totalorder %s881_s28, %s881_s28 }
  0x4f   :  { %v763_v14 = vld [vmem:[#allocation5 + $0x20] sm:$0xff]   ;;  %v765_v16 = vld [vmem:[#allocation5 + $0x30] sm:$0xff]   ;;  %v766_v17 = vld [vmem:[#allocation5 + $0x38] sm:$0xff]  }
  0x50   :  { %v588_v18 = vld [vmem:[%s1155_s2] ss:$0 sm:$0xff]  ;;  %v768_v27 = vld [vmem:[#allocation7 + $0x8] sm:$0xff]   ;;  %v769_v28 = vld [vmem:[#allocation7 + $0x10] sm:$0xff]   ;;  %p888_p7 = por %p887_p6, %p886_p5 }
  0x51   :  { %664 = vmatpush3.bf16.msra.mxu0 %v752_v2  ;;  %684 = vmatpush3.bf16.msra.mxu1 %v760_v6  ;;  %v767_v26 = vld [vmem:[#allocation7] sm:$0xff]   ;;  %v770_v29 = vld [vmem:[#allocation7 + $0x18] sm:$0xff]   ;;  %v772_v38 = vld [vmem:[#allocation7 + $0x28] sm:$0xff]  }
  0x52   :  { %665 = vmatprep.subr.bf16.mxu0 %v941_v0  ;;  %685 = vmatprep.subr.bf16.mxu1 %v941_v0  ;;  %v597_v30 = vld [vmem:[%s1157_s4] ss:$0 sm:$0xff]  ;;  %v773_v39 = vld [vmem:[#allocation7 + $0x30] sm:$0xff]   ;;  %v774_v40 = vld [vmem:[#allocation7 + $0x38] sm:$0xff]   ;;  %p889_p8 = pnand %p888_p7, %p882_p4 }
  0x53   :  { %v771_v37 = vld [vmem:[#allocation7 + $0x20] sm:$0xff]   ;;  %v776_v42 = vld [vmem:[#allocation8 + $0x8] sm:$0xff]   ;;  %v777_v43 = vld [vmem:[#allocation8 + $0x10] sm:$0xff]  }
  0x54   :  { %v775_v41 = vld [vmem:[#allocation8] sm:$0xff]   ;;  %v778_v44 = vld [vmem:[#allocation8 + $0x18] sm:$0xff]   ;;  %v780_v51 = vld [vmem:[#allocation8 + $0x28] sm:$0xff]  }
  0x55   :  { %666 = vmatpush3.bf16.msra.mxu0 %v753_v3  ;;  %686 = vmatpush3.bf16.msra.mxu1 %v761_v8  ;;  %v779_v50 = vld [vmem:[#allocation8 + $0x20] sm:$0xff]   ;;  %v781_v52 = vld [vmem:[#allocation8 + $0x30] sm:$0xff]   ;;  %v782_v53 = vld [vmem:[#allocation8 + $0x38] sm:$0xff]  }
  0x56   :  { %667 = vmatprep.subr.bf16.mxu0 %v941_v0  ;;  %687 = vmatprep.subr.bf16.mxu1 %v941_v0  ;;  %v606_v54 = vld [vmem:[%s1159_s6] ss:$0 sm:$0xff] }
  0x59   :  { %668 = vmatpush3.bf16.msra.mxu0 %v754_v5  ;;  %688 = vmatpush3.bf16.msra.mxu1 %v762_v10 }
  0x5a   :  { %669 = vmatprep.subr.bf16.mxu0 %v941_v0  ;;  %689 = vmatprep.subr.bf16.mxu1 %v941_v0 }
  0x5d   :  { %670 = vmatpush3.bf16.msra.mxu0 %v755_v7  ;;  %690 = vmatpush3.bf16.msra.mxu1 %v763_v14 }
  0x5e   :  { %671 = vmatprep.subr.bf16.mxu0 %v941_v0  ;;  %691 = vmatprep.subr.bf16.mxu1 %v941_v0 }
  0x61   :  { %672 = vmatpush3.bf16.msra.mxu0 %v756_v9  ;;  %692 = vmatpush3.bf16.msra.mxu1 %v764_v15 }
  0x62   :  { %673 = vmatprep.subr.bf16.mxu0 %v941_v0  ;;  %693 = vmatprep.subr.bf16.mxu1 %v941_v0 }
  0x65   :  { %674 = vmatpush3.bf16.msra.mxu0 %v757_v11  ;;  %694 = vmatpush3.bf16.msra.mxu1 %v765_v16 }
  0x66   :  { %675 = vmatprep.subr.bf16.mxu0 %v941_v0  ;;  %695 = vmatprep.subr.bf16.mxu1 %v941_v0 }
  0x69   :  { %676 = vmatpush3.bf16.msra.mxu0 %v758_v12  ;;  %696 = vmatpush3.bf16.msra.mxu1 %v766_v17 }
  0x6a   :  { %701 = vmatprep.subr.bf16.mxu0 %v941_v0  ;;  %721 = vmatprep.subr.bf16.mxu1 %v941_v0 }
  0x6c   :  { %678 = vmatmul.mubr.bf16.vlgmr.msra.gmra.mrb[0].mxu0 %v92_v13 }
  0x6d   :  { %717 = vmatprep.mubr.msk.bf16.mxu0 %vm942_vm0, %v941_v0  ;;  %702 = vmatpush3.bf16.msra.mxu0 %v767_v26 }
  0x6e   :  { %703 = vmatprep.subr.bf16.mxu0 %v941_v0 }
  0x71   :  { %704 = vmatpush3.bf16.msra.mxu0 %v768_v27 }
  0x72   :  { %705 = vmatprep.subr.bf16.mxu0 %v941_v0 }
  0x75   :  { %706 = vmatpush3.bf16.msra.mxu0 %v769_v28 }
  0x76   :  { %707 = vmatprep.subr.bf16.mxu0 %v941_v0 }
  0x79   :  { %708 = vmatpush3.bf16.msra.mxu0 %v770_v29 }
  0x7a   :  { %709 = vmatprep.subr.bf16.mxu0 %v941_v0 }
  0x7d   :  { %710 = vmatpush3.bf16.msra.mxu0 %v771_v37 }
  0x7e   :  { %711 = vmatprep.subr.bf16.mxu0 %v941_v0 }
  0x81   :  { %712 = vmatpush3.bf16.msra.mxu0 %v772_v38 }
  0x82   :  { %713 = vmatprep.subr.bf16.mxu0 %v941_v0 }
  0x85   :  { %714 = vmatpush3.bf16.msra.mxu0 %v773_v39 }
  0x86   :  { %715 = vmatprep.subr.bf16.mxu0 %v941_v0 }
  0x89   :  { %716 = vmatpush3.bf16.msra.mxu0 %v774_v40 }
 0x13f   :  { %v198_v19 = vpop.f32.mrb[0].mxu0 }
 0x140   :  { %v199_v20 = vadd.f32 %v588_v18, %v198_v19  ;;  %v679_v21 = vpop.f32.mrb[1].mxu0 }
 0x141   :  { %v201_v22 = vpop.f32.mrb[2].mxu0 }
 0x142   :  { %v204_v23 = vpack.c.bf16 %v199_v20, %v199_v20  ;;  %v680_v24 = vpop.f32.mrb[3].mxu0 }
 0x144   :  { %783 = vtanh.bf16 %v204_v23 }
 0x14f   :  { %v784_v25 = vpop.eup %783 }
 0x150   :  { %698 = vmatmul.mubr.bf16.vlgmr.msra.gmra.mrb[0].mxu1 %v784_v25 }
 0x151   :  { %737 = vmatprep.mubr.msk.bf16.mxu1 %vm942_vm0, %v941_v0  ;;  %722 = vmatpush3.bf16.msra.mxu1 %v775_v41 }
 0x152   :  { %723 = vmatprep.subr.bf16.mxu1 %v941_v0 }
 0x155   :  { %724 = vmatpush3.bf16.msra.mxu1 %v776_v42 }
 0x156   :  { %725 = vmatprep.subr.bf16.mxu1 %v941_v0 }
 0x159   :  { %726 = vmatpush3.bf16.msra.mxu1 %v777_v43 }
 0x15a   :  { %727 = vmatprep.subr.bf16.mxu1 %v941_v0 }
 0x15d   :  { %728 = vmatpush3.bf16.msra.mxu1 %v778_v44 }
 0x15e   :  { %729 = vmatprep.subr.bf16.mxu1 %v941_v0 }
 0x161   :  { %730 = vmatpush3.bf16.msra.mxu1 %v779_v50 }
 0x162   :  { %731 = vmatprep.subr.bf16.mxu1 %v941_v0 }
 0x165   :  { %732 = vmatpush3.bf16.msra.mxu1 %v780_v51 }
 0x166   :  { %733 = vmatprep.subr.bf16.mxu1 %v941_v0 }
 0x169   :  { %734 = vmatpush3.bf16.msra.mxu1 %v781_v52 }
 0x16a   :  { %735 = vmatprep.subr.bf16.mxu1 %v941_v0 }
 0x16d   :  { %736 = vmatpush3.bf16.msra.mxu1 %v782_v53 }
 0x223   :  { %v311_v31 = vpop.f32.mrb[0].mxu1 }
 0x224   :  { %v312_v32 = vadd.f32 %v597_v30, %v311_v31  ;;  %v699_v33 = vpop.f32.mrb[1].mxu1 }
 0x225   :  { %v314_v34 = vpop.f32.mrb[2].mxu1 }
 0x226   :  { %v700_v35 = vpop.f32.mrb[3].mxu1  ;;  %v317_v36 = vmul.f32 %v312_v32, %v312_v32 }
 0x228   :  { %318 = vadd.xlane.f32.xlu0 %v317_v36 }
 0x2b5   :  { %v319_v45 = vpop.xlane.xlu0 %318 }
 0x2b6   :  { %v320_v46 = vmax.f32 %v319_v45, 1e-24 }
 0x2b8   :  { %785 = vrsqrt.f32 %v320_v46 }
 0x2c2   :  { %v786_v47 = vpop.eup %785 }
 0x2c3   :  { %v322_v48 = vmul.f32 %v786_v47, %v312_v32 }
 0x2c5   :  { %v323_v49 = vpack.c.bf16 %v322_v48, %v322_v48 }
 0x2c7   :  { %718 = vmatmul.mubr.bf16.vlgmr.msra.gmra.mrb[4].mxu0 %v323_v49  ;;  %556 = vst [vmem:[#allocation11] sm:$0xf] %v323_v49 }
 0x39a   :  { %v429_v55 = vpop.f32.mrb[4].mxu0 }
 0x39b   :  { %v430_v56 = vadd.f32 %v606_v54, %v429_v55  ;;  %v719_v57 = vpop.f32.mrb[5].mxu0 }
 0x39c   :  { %v432_v58 = vpop.f32.mrb[6].mxu0 }
 0x39d   :  { %v435_v59 = vpack.c.bf16 %v430_v56, %v430_v56  ;;  %v720_v60 = vpop.f32.mrb[7].mxu0 }
 0x39f   :  { %787 = vtanh.bf16 %v435_v59 }
 0x3aa   :  { %v788_v61 = vpop.eup %787 }
 0x3ab   :  { %738 = vmatmul.mubr.bf16.vlgmr.msra.gmra.mrb[4].mxu1 %v788_v61 }
 0x3ac   :  { %892 = shalt.err (!%p889_p8)
}
 0x3ad   :  { %s893_s30 = scalar_lea.hbm %s1163_s10, 64 }
 0x3ae   :  { %p894_p9 = scmp.ne.s32.totalorder %s1163_s10, %s893_s30  ;;  %p897_p10 = scmp.lt.u32.totalorder %s893_s30, %s1163_s10 }
 0x3b0   :  { %p899_p11 = pnand %p897_p10, %p894_p9 }
 0x3b2   :  { %902 = shalt.err (!%p899_p11)
}
 0x3b3   :  { %576 = dma.vmem_to_hbm [thread:$0]  %s574_s27, 64, %s1163_s10, [#allocation12]   ;;  %v615_v62 = vld [vmem:[%s1161_s8] ss:$0 sm:$0xff] }
 0x3b4   :  { %s944_s3 = smov [#allocation10]  }
 0x3b5   :  { %s563_s14 = sshll.u32 %s944_s3, 4  ;;  %s564_s14 = int_to_ptr.vmem [resolvable:$true] %s563_s14 }
 0x3b6   :  { %s903_s10 = scalar_lea.vmem %s564_s14, 64  ;;  %p908_p13 = scmp.lt.s32.totalorder %s564_s14, %s564_s14 }
 0x3b7   :  { %p904_p12 = scmp.ne.s32.totalorder %s564_s14, %s903_s10  ;;  %p909_p0 = scmp.lt.s32.totalorder %s903_s10, %s903_s10 }
 0x3b9   :  { %p910_p1 = por %p909_p0, %p908_p13 }
 0x3bb   :  { %p911_p2 = pnand %p910_p1, %p904_p12 }
 0x47e   :  { %v542_v63 = vpop.f32.mrb[4].mxu1 }
 0x47f   :  { %v543_v0 = vadd.f32 %v615_v62, %v542_v63  ;;  %v739_v1 = vpop.f32.mrb[5].mxu1 }
 0x480   :  { %v545_v2 = vpop.f32.mrb[6].mxu1 }
 0x481   :  { %v624_v3 = vmul.f32 -1.442695, %v543_v0  ;;  %v740_v4 = vpop.f32.mrb[7].mxu1 }
 0x483   :  { %789 = vpow2.f32 %v624_v3 }
 0x48d   :  { %v790_v5 = vpop.eup %789 }
 0x48e   :  { %v551_v6 = vadd.f32 1.0, %v790_v5 }
 0x490   :  { %791 = vrcp.f32 %v551_v6 }
 0x49a   :  { %v792_v7 = vpop.eup %791 }
 0x49b   :  { %v554_v8 = vpack.c.bf16 %v792_v7, %v792_v7 }
 0x49d   :  { %555 = vst [vmem:[#allocation10] sm:$0xf] %v554_v8 }
 0x49e   :  { %914 = shalt.err (!%p911_p2)
}
 0x49f   :  { %s915_s21 = scalar_lea.hbm %s1162_s9, 64 }
 0x4a0   :  { %p916_p3 = scmp.ne.s32.totalorder %s1162_s9, %s915_s21  ;;  %p919_p4 = scmp.lt.u32.totalorder %s915_s21, %s1162_s9 }
 0x4a2   :  { %p921_p5 = pnand %p919_p4, %p916_p3 }
 0x4a4   :  { %924 = shalt.err (!%p921_p5)
}
 0x4a5   :  { %566 = dma.vmem_to_hbm [thread:$0]  %s564_s14, 64, %s1162_s9, [#allocation4]  }
 0x4a6   :  { %931 = dma.done.wait [#allocation4], 64  }
 0x4a7   :  { %932 = vsyncadd [#allocation4], 4294967232 }
 0x4a8   :  { %933 = dma.done.wait [#allocation12], 64  }
 0x4a9   :  { %934 = vsyncadd [#allocation12], 4294967232 }
 0x4aa   :  { %583 = vsyncpa [#allocation3], 1 }
 0x4ab   :  { %584 = vsyncpa [#allocation6], 1 }
 0x4ac   :  { %585 = vsyncpa [#allocation9], 1 }
 0x4ad   :  { %586 = vsyncpa [#allocation4], 1 }
 0x4ae   :  { %587 = vsyncpa [#allocation12], 1 }

</bundles_post_ra>
